<compile_context>
chip_gen: v7x
topology: tpu7x:2x2x1
jax: 0.10.0
libtpu: 0.0.40
codegen_flags: <defaults>
</compile_context>

<pallas_src>
import jax
import jax.numpy as jnp
from jax.experimental import pallas as pl
from jax.experimental.pallas import tpu as pltpu


def perceptron_kernel(x_ref, w_ref, b_ref, o_ref):
    """One batch tile.

    x_ref: (TM, F) VMEM  -- batch tile, native row-major layout.
    w_ref: (1, F)  VMEM  -- resident across all batch tiles (constant index_map).
    b_ref: (1, 1)  SMEM  -- bias scalar.
    o_ref: (TM, 1) VMEM  -- output column for this tile.
    """
    x = x_ref[...].astype(jnp.float32)            # (TM, F)
    w = w_ref[...].astype(jnp.float32)            # (1, F), sublane-broadcast
    # VPU multiply + lane (XLU) reduction, f32 accumulate. No MXU for N=1.
    y = jnp.sum(x * w, axis=1, keepdims=True)     # (TM, 1)
    y = y + b_ref[0, 0].astype(jnp.float32)
    o_ref[...] = jax.nn.sigmoid(y).astype(o_ref.dtype)


def _device_kind():
    try:
        return jax.devices()[0].device_kind.lower()
    except Exception:
        return ""


def _pick_batch_tile(batch, n_features, x_dtype):
    """Sublane-axis batch tile sized by bytes.

    Targets ~2-4 MiB of x per grid step (chip-generation aware) so the per-step
    overhead is amortized, while keeping the double-buffered x tiles inside a
    conservative scoped-VMEM budget (tighter on v5e's 16 MiB default)."""
    itemsize = jnp.dtype(x_dtype).itemsize
    row_bytes = n_features * itemsize
    kind = _device_kind()
    if "v5" in kind:
        # v5e: ~0.8 TB/s HBM -> 1-2 MiB tiles already amortize the step
        # overhead; 12 MiB budget leaves headroom under the 16 MiB default
        # scoped VMEM.
        tile_bytes_target = 2 * 1024 * 1024
        x_vmem_budget = 12 * 1024 * 1024
    elif "v7" in kind or "7x" in kind:
        # v7x: ~3.2 TB/s HBM -> push toward 4 MiB tiles; 32 MiB default scoped
        # VMEM (64 MiB physical), keep the x double-buffer under 24 MiB.
        tile_bytes_target = 4 * 1024 * 1024
        x_vmem_budget = 24 * 1024 * 1024
    else:
        # v6e and unknown.
        tile_bytes_target = 3 * 1024 * 1024
        x_vmem_budget = 24 * 1024 * 1024

    # Guard the wide-perceptron case: even a minimal (8, F) double-buffered
    # tile must fit the budget.
    if 2 * 8 * row_bytes > x_vmem_budget:
        # TODO(synk): add a feature (K) grid axis with an f32 scratch
        # accumulator + pl.when init/finalize for very large n_features.
        raise ValueError(
            f"n_features={n_features} too large for a single resident feature "
            f"slab within the VMEM budget ({x_vmem_budget} bytes)")

    tm = tile_bytes_target // row_bytes
    tm = min(tm, x_vmem_budget // (2 * row_bytes))   # double-buffer fits VMEM
    tm = (tm // 8) * 8                               # sublane alignment

    # Prefer >=2 grid steps (so "parallel" can shard across v7x's 2 TCs) as
    # long as each step still moves a non-trivial amount of x.
    half = pl.cdiv(pl.cdiv(batch, 2), 8) * 8
    if half * row_bytes >= 512 * 1024:
        tm = min(tm, half)

    b_rounded = pl.cdiv(batch, 8) * 8
    tm = min(tm, b_rounded)                          # don't tile wider than B
    return max(tm, 8)


def perceptron_forward(x, weight, bias):
    """x: (B, F), weight: (1, F) (PyTorch Linear layout), bias: (1,) -> (B, 1)."""
    B, F = x.shape
    tm = _pick_batch_tile(B, F, x.dtype)

    w_row = weight.reshape(1, F)      # (1, F) row, resident in VMEM
    b_smem = bias.reshape(1, 1)       # (1, 1) scalar for SMEM

    out = pl.pallas_call(
        perceptron_kernel,
        out_shape=jax.ShapeDtypeStruct((B, 1), x.dtype),
        grid_spec=pltpu.PrefetchScalarGridSpec(
            num_scalar_prefetch=0,
            grid=(pl.cdiv(B, tm),),   # partial last block handled by masking
            in_specs=[
                # x tile: batch tile i on the sublane axis, full F on lanes.
                pl.BlockSpec((tm, F), lambda i: (i, 0)),
                # weight row: constant block index -> DMA'd once, resident.
                pl.BlockSpec((1, F), lambda i: (0, 0)),
                # bias scalar in SMEM (no VMEM double-buffer pair for 4 bytes).
                pl.BlockSpec((1, 1), lambda i: (0, 0),
                             memory_space=pltpu.MemorySpace.SMEM),
            ],
            out_specs=pl.BlockSpec((tm, 1), lambda i: (i, 0)),
        ),
        compiler_params=pltpu.CompilerParams(
            dimension_semantics=("parallel",),   # lets v7x use both TCs
        ),
    )(x, w_row, b_smem)
    return out


if __name__ == "__main__":
    key = jax.random.PRNGKey(0)
    k_x, k_w, k_b = jax.random.split(key, 3)

    B, F = 8, 32  # batch=8, n_features=32

    x = jax.random.normal(k_x, (B, F), dtype=jnp.float32)
    # Deterministic init mimicking nn.Linear's uniform(-1/sqrt(F), 1/sqrt(F)).
    bound = 1.0 / jnp.sqrt(jnp.float32(F))
    weight = jax.random.uniform(k_w, (1, F), minval=-bound, maxval=bound,
                                dtype=jnp.float32)
    bias = jax.random.uniform(k_b, (1,), minval=-bound, maxval=bound,
                              dtype=jnp.float32)

    out = perceptron_forward(x, weight, bias)
    out = jax.block_until_ready(out)

    ref = jax.nn.sigmoid(x @ weight.T + bias)
    assert out.shape == (B, 1)
    assert jnp.allclose(out, ref, atol=1e-5, rtol=1e-5)

    # Also exercise a batch that is not tile/sublane aligned (masked last block).
    B2 = 13
    x2 = jax.random.normal(k_x, (B2, F), dtype=jnp.float32)
    out2 = jax.block_until_ready(perceptron_forward(x2, weight, bias))
    ref2 = jax.nn.sigmoid(x2 @ weight.T + bias)
    assert out2.shape == (B2, 1)
    assert jnp.allclose(out2, ref2, atol=1e-5, rtol=1e-5)

    print("KERNEL_OK")
</pallas_src>

<mosaic_0001>
module attributes {stable_mosaic.version = 11 : i64} {
  func.func @perceptron_kernel(%arg0: i32, %arg1: memref<8x32xf32, #tpu.memory_space<vmem>>, %arg2: memref<1x32xf32, #tpu.memory_space<vmem>>, %arg3: memref<1x1xf32, #tpu.memory_space<smem>>, %arg4: memref<8x1xf32, #tpu.memory_space<vmem>>) attributes {dimension_semantics = [#tpu.dimension_semantics<parallel>], iteration_bounds = array<i64: 1>, scalar_prefetch = 0 : i64, scratch_operands = 0 : i64, tpu.core_type = #tpu.core_type<tc>, window_params = [{transform_indices = @transform_0, window_bounds = array<i64: 8, 32>}, {pipeline_mode = #tpu.pipeline_mode<synchronous>, transform_indices = @transform_1, window_bounds = array<i64: 1, 32>}, {transform_indices = @transform_2, window_bounds = array<i64: 1, 1>}, {transform_indices = @transform_3, window_bounds = array<i64: 8, 1>}]} {
    %c0 = arith.constant 0 : index
    %c0_0 = arith.constant 0 : index
    %0 = vector.load %arg1[%c0, %c0_0] : memref<8x32xf32, #tpu.memory_space<vmem>>, vector<8x32xf32>
    %c0_1 = arith.constant 0 : index
    %c0_2 = arith.constant 0 : index
    %1 = vector.load %arg2[%c0_1, %c0_2] : memref<1x32xf32, #tpu.memory_space<vmem>>, vector<1x32xf32>
    %2 = vector.broadcast %1 : vector<1x32xf32> to vector<8x32xf32>
    %3 = arith.mulf %0, %2 : vector<8x32xf32>
    %cst = arith.constant dense<0.000000e+00> : vector<8xf32>
    %4 = vector.multi_reduction <add>, %3, %cst [1] : vector<8x32xf32> to vector<8xf32>
    %5 = vector.shape_cast %4 : vector<8xf32> to vector<8x1xf32>
    %c0_3 = arith.constant 0 : index
    %c0_4 = arith.constant 0 : index
    %6 = memref.load %arg3[%c0_3, %c0_4] : memref<1x1xf32, #tpu.memory_space<smem>>
    %7 = vector.broadcast %6 : f32 to vector<8x1xf32>
    %8 = arith.addf %5, %7 : vector<8x1xf32>
    %9 = arith.negf %8 : vector<8x1xf32>
    %10 = math.exp %9 : vector<8x1xf32>
    %cst_5 = arith.constant 1.000000e+00 : f32
    %11 = vector.broadcast %cst_5 : f32 to vector<8x1xf32>
    %12 = arith.addf %11, %10 : vector<8x1xf32>
    %13 = arith.divf %11, %12 : vector<8x1xf32>
    %c0_6 = arith.constant 0 : index
    %c0_7 = arith.constant 0 : index
    %14 = vector.load %arg4[%c0_6, %c0_7] : memref<8x1xf32, #tpu.memory_space<vmem>>, vector<8x1xf32>
    tpu.vector_store %arg4[%c0_6, %c0_7], %13 {strides = array<i32>} : memref<8x1xf32, #tpu.memory_space<vmem>>, vector<8x1xf32>,
    return
  }
  func.func @transform_0(%arg0: i32) -> (i32, i32) {
    %c0_i32 = arith.constant 0 : i32
    %c0_i32_0 = arith.constant 0 : i32
    return %arg0, %c0_i32 : i32, i32
  }
  func.func @transform_1(%arg0: i32) -> (i32, i32) {
    %c0_i32 = arith.constant 0 : i32
    %c0_i32_0 = arith.constant 0 : i32
    %c0_i32_1 = arith.constant 0 : i32
    return %c0_i32, %c0_i32_0 : i32, i32
  }
  func.func @transform_2(%arg0: i32) -> (i32, i32) {
    %c0_i32 = arith.constant 0 : i32
    %c0_i32_0 = arith.constant 0 : i32
    %c0_i32_1 = arith.constant 0 : i32
    return %c0_i32, %c0_i32_0 : i32, i32
  }
  func.func @transform_3(%arg0: i32) -> (i32, i32) {
    %c0_i32 = arith.constant 0 : i32
    %c0_i32_0 = arith.constant 0 : i32
    return %arg0, %c0_i32 : i32, i32
  }
}

</mosaic_0001>

<bundles_post_ra>
// kernel: tpu_custom_call.1
= control target key start
LH: loop header
LB: loop body
LE: loop exit
PB: predicated region body
PF: predicated region fallthrough
CT: control target
= control target key end

     0   :  { %9 = vsyncpa [#allocation4], 0  ;;  %s87_s12 = smov [#allocation3]   ;;  %s129_s0 = inlined_call_operand.hbm [shape: f32[8,32], index: 0, kind: input, shape index: {}]   ;;  %s130_s1 = inlined_call_operand.vmem [shape: f32[1,32], index: 1, kind: input, shape index: {}]   ;;  %s131_s2 = inlined_call_operand.<no memory space> [shape: f32[1,1], index: 2, kind: input, shape index: {}]   ;;  %s132_s3 = inlined_call_operand.vmem [shape: f32[8,1], index: 3, kind: output, shape index: {}]  }
   0x1   :  { %s16_s13 = sshll.u32 %s87_s12, 4  ;;  %s63_s16 = scalar_lea.hbm %s129_s0, 128  ;;  %s17_s13 = int_to_ptr.vmem [resolvable:$true] %s16_s13 }
   0x2   :  { %p64_p0 = scmp.ne.s32.totalorder %s129_s0, %s63_s16  ;;  %p67_p1 = scmp.lt.u32.totalorder %s63_s16, %s129_s0 }
   0x4   :  { %p69_p2 = pnand %p67_p1, %p64_p0 }
   0x6   :  { %72 = shalt.err (!%p69_p2)
}
   0x7   :  { %s73_s21 = scalar_lea.vmem %s17_s13, 128  ;;  %p78_p4 = scmp.lt.s32.totalorder %s17_s13, %s17_s13 }
   0x8   :  { %p74_p3 = scmp.ne.s32.totalorder %s17_s13, %s73_s21  ;;  %p79_p5 = scmp.lt.s32.totalorder %s73_s21, %s73_s21 }
   0xa   :  { %p80_p6 = por %p79_p5, %p78_p4 }
   0xc   :  { %p81_p7 = pnand %p80_p6, %p74_p3 }
   0xe   :  { %84 = shalt.err (!%p81_p7)
}
   0xf   :  { %19 = dma.hbm_to_vmem [thread:$0]  %s129_s0, 128, %s17_s13, [#allocation4]  }
  0x10   :  { %85 = dma.done.wait [#allocation4], 128  }
  0x11   :  { %86 = vsyncadd [#allocation4], 4294967168  ;;  %v27_v0 = vld [vmem:[#allocation3] sm:$0xff]  ;;  %vm36_vm0 = vcmask 261120   ;;  %v41_v4 = vstv %s131_s2  ;;  %vm49_vm1 = vcmask 7168  }
  0x12   :  { %v56_v1 = vld [vmem:[%s130_s1] ss:$0 sm:$0xff] }
  0x13   :  { %v35_v2 = vmul.f32 %v56_v1, %v27_v0 }
  0x15   :  { %v37_v3 = vsel %vm36_vm0, %v35_v2, 0.0 }
  0x16   :  { %38 = vadd.xlane.f32.xlu0 %v37_v3 }
  0xa3   :  { %v39_v5 = vpop.xlane.xlu0 %38 }
  0xa4   :  { %v42_v6 = vadd.f32 %v41_v4, %v39_v5 }
  0xa6   :  { %v57_v7 = vmul.f32 -1.442695, %v42_v6 }
  0xa8   :  { %59 = vpow2.f32 %v57_v7 }
  0xb2   :  { %v60_v8 = vpop.eup %59 }
  0xb3   :  { %v46_v9 = vadd.f32 1.0, %v60_v8 }
  0xb5   :  { %61 = vrcp.f32 %v46_v9 }
  0xbf   :  { %v62_v10 = vpop.eup %61 }
  0xc0   :  { %50 = vst.msk [vmem:[%s132_s3] sm:$0xff] %vm49_vm1, %v62_v10 }
  0xc1   :  { %55 = vsyncpa [#allocation4], 1 }

</bundles_post_ra>
